<compile_context>
chip_gen: v5e
topology: v5e:2x2
jax: 0.10.0
libtpu: 0.0.40
codegen_flags: <defaults>
</compile_context>

<pallas_src>
import functools

import jax
import jax.numpy as jnp
from jax.experimental import pallas as pl
from jax.experimental.pallas import tpu as pltpu


def _round_up(a, m):
    return ((a + m - 1) // m) * m


def _loss_kernel(x_ref, y_ref, o_ref, *, hw, inv_denom, batch, tb, need_mask):
    # x_ref/y_ref: (tb, 2*hw) f32 VMEM blocks; channel split is a lane-aligned
    # static slice (hw % 128 == 0) -> full unmasked vreg loads, no relayout.
    x = x_ref[...]
    y = y_ref[...]
    x0, x1 = x[:, :hw], x[:, hw:]
    y0, y1 = y[:, :hw], y[:, hw:]

    # Weighted BCE-style term on channel 0 (2 EUP logs per element).
    bce = -(y0 * jnp.log(x0) * 10.0 + (1.0 - y0) * jnp.log(1.0 - x0))

    # Masked L1 on channel 1. Exact `== 1` semantics of the PyTorch loop.
    # 1/denom is applied inside the select so a zero denominator (H == 2 ->
    # H ^ 2 == 0) reproduces torch's inf/nan behavior only where y0 == 1.
    l1 = jnp.where(y0 == 1.0, jnp.abs(y1 - x1) * inv_denom, 0.0)

    # One fused per-element term, one reduction.
    val = bce + l1                                        # (tb, hw)

    if need_mask:
        # Zero out batch-padding rows (B was padded up to a multiple of tb).
        row = (jax.lax.broadcasted_iota(jnp.int32, (tb, 1), 0)
               + pl.program_id(0) * tb)
        val = jnp.where(row < batch, val, 0.0)

    # Reduce to an (8,128) lane-dense partial with VPU adds only:
    #   1) fold lane chunks (vreg-aligned static slices),
    #   2) fold groups of 8 rows (sublane-tile aligned leading-dim split).
    acc = val[:, :128]
    for c in range(1, hw // 128):
        acc = acc + val[:, c * 128:(c + 1) * 128]         # (tb, 128)
    o_ref[...] = acc.reshape(tb // 8, 8, 128).sum(axis=0)  # (8, 128), unmasked


def loss_forward(x, y):
    """x, y: [B, C, H, W] with C >= 2. Returns scalar float32 total loss."""
    B, C, H, W = x.shape
    assert C >= 2 and y.shape == x.shape
    hw = H * W
    assert hw % 128 == 0, "H*W must be a multiple of 128"

    # NOTE: `x.shape[2] ^ 2` in the original PyTorch code is XOR, not power.
    denom = float(H ^ 2)
    inv_denom = (1.0 / denom) if denom != 0.0 else float("inf")

    # Channels 0/1 fused into one lane-dense axis: (B, 2*hw). For C == 2 the
    # slice is a no-op; for C > 2 it is one extra HBM pass (the kernel itself
    # never reads channels >= 2).
    x2 = x[:, :2, :, :].astype(jnp.float32).reshape(B, 2 * hw)
    y2 = y[:, :2, :, :].astype(jnp.float32).reshape(B, 2 * hw)

    # Batch tile: ~4 MiB per input block (>= 8 MiB of input per grid step so
    # the ~0.35 us per-step overhead is <5%), multiple of 8 so sublanes are
    # fully used and the in-kernel 8-row fold is exact.
    row_bytes = 2 * hw * 4
    tb_cap = max(8, (4 << 20) // row_bytes // 8 * 8)
    b8 = _round_up(B, 8)
    tb = min(tb_cap, b8)
    # v7x megacore: prefer >= 2 grid steps (one per TensorCore) as long as
    # each step still moves a multi-MiB tile; at that size the extra step is
    # essentially free on single-TC chips too.
    if tb == b8 and tb > 8:
        half = _round_up(tb // 2, 8)
        if half < tb and half * row_bytes >= (2 << 20):
            tb = half
    b_pad = _round_up(B, tb)
    grid = b_pad // tb

    need_mask = b_pad != B
    if need_mask:
        pad = b_pad - B
        # x padded with 0.5 keeps both logs finite; padded rows are zeroed by
        # the in-kernel row mask before the reduction.
        x2 = jnp.concatenate(
            [x2, jnp.full((pad, 2 * hw), 0.5, jnp.float32)], axis=0)
        y2 = jnp.concatenate(
            [y2, jnp.zeros((pad, 2 * hw), jnp.float32)], axis=0)

    kernel = functools.partial(
        _loss_kernel, hw=hw, inv_denom=inv_denom, batch=B, tb=tb,
        need_mask=need_mask)

    # 2 inputs x 2 pipeline buffers + headroom for in-kernel temporaries;
    # capped well below v7x's 64 MiB physical VMEM (v5e/v6e have 128 MiB).
    block_bytes = tb * 2 * hw * 4
    vmem_limit = int(min(48 << 20, max(16 << 20, 6 * block_bytes + (2 << 20))))

    partials = pl.pallas_call(
        kernel,
        out_shape=jax.ShapeDtypeStruct((grid * 8, 128), jnp.float32),
        grid_spec=pltpu.PrefetchScalarGridSpec(
            num_scalar_prefetch=0,
            grid=(grid,),
            in_specs=[
                pl.BlockSpec((tb, 2 * hw), lambda i: (i, 0)),  # x
                pl.BlockSpec((tb, 2 * hw), lambda i: (i, 0)),  # y
            ],
            out_specs=pl.BlockSpec((8, 128), lambda i: (i, 0)),
        ),
        compiler_params=pltpu.CompilerParams(
            dimension_semantics=("parallel",),
            vmem_limit_bytes=vmem_limit,
        ),
        cost_estimate=pl.CostEstimate(
            flops=12 * b_pad * hw,
            transcendentals=2 * b_pad * hw,
            bytes_accessed=2 * b_pad * 2 * hw * 4 + grid * 8 * 128 * 4,
        ),
    )(x2, y2)

    # Final tiny reduction of the lane-dense per-step partials (exact: every
    # element is a genuine partial sum, padded rows contribute zero).
    return jnp.sum(partials)


def _reference(x, y):
    # Pure-JAX reference mirroring the PyTorch loops.
    B, C, H, W = x.shape
    y0, x0 = y[:, 0], x[:, 0]
    y1, x1 = y[:, 1], x[:, 1]
    l0 = jnp.sum(-(y0 * jnp.log(x0) * 10.0 + (1.0 - y0) * jnp.log(1.0 - x0)))
    l1 = jnp.sum(jnp.where(y0 == 1.0, jnp.abs(y1 - x1), 0.0)) / float(H ^ 2)
    return l0 + l1


if __name__ == "__main__":
    key = jax.random.PRNGKey(0)
    k_x, k_y0, k_y1 = jax.random.split(key, 3)

    B, C, H, W = 2, 2, 16, 16
    # x must lie strictly in (0, 1) so that log(x) and log(1-x) are finite.
    x = jax.random.uniform(k_x, (B, C, H, W), dtype=jnp.float32,
                           minval=0.05, maxval=0.95)
    # y channel 0 is a binary mask; channel 1 is an arbitrary target map.
    y0 = jax.random.bernoulli(k_y0, p=0.3, shape=(B, 1, H, W)).astype(jnp.float32)
    y1 = jax.random.uniform(k_y1, (B, 1, H, W), dtype=jnp.float32)
    y = jnp.concatenate([y0, y1], axis=1)

    total = loss_forward(x, y)
    jax.block_until_ready(total)

    ref = _reference(x, y)
    assert jnp.allclose(total, ref, rtol=2e-5, atol=1e-3), (total, ref)

    print("KERNEL_OK")
</pallas_src>

<mosaic_0001>
module attributes {stable_mosaic.version = 11 : i64} {
  func.func @_loss_kernel(%arg0: i32, %arg1: memref<8x512xf32, #tpu.memory_space<vmem>>, %arg2: memref<8x512xf32, #tpu.memory_space<vmem>>, %arg3: memref<8x128xf32, #tpu.memory_space<vmem>>) attributes {dimension_semantics = [#tpu.dimension_semantics<parallel>], iteration_bounds = array<i64: 1>, scalar_prefetch = 0 : i64, scratch_operands = 0 : i64, tpu.core_type = #tpu.core_type<tc>, window_params = [{transform_indices = @transform_0, window_bounds = array<i64: 8, 512>}, {transform_indices = @transform_1, window_bounds = array<i64: 8, 512>}, {transform_indices = @transform_2, window_bounds = array<i64: 8, 128>}]} {
    %c0 = arith.constant 0 : index
    %c0_0 = arith.constant 0 : index
    %0 = vector.load %arg1[%c0, %c0_0] : memref<8x512xf32, #tpu.memory_space<vmem>>, vector<8x512xf32>
    %c0_1 = arith.constant 0 : index
    %c0_2 = arith.constant 0 : index
    %1 = vector.load %arg2[%c0_1, %c0_2] : memref<8x512xf32, #tpu.memory_space<vmem>>, vector<8x512xf32>
    %2 = vector.extract_strided_slice %0 {offsets = [0, 0], sizes = [8, 256], strides = [1, 1]} : vector<8x512xf32> to vector<8x256xf32>
    %3 = vector.extract_strided_slice %0 {offsets = [0, 256], sizes = [8, 256], strides = [1, 1]} : vector<8x512xf32> to vector<8x256xf32>
    %4 = vector.extract_strided_slice %1 {offsets = [0, 0], sizes = [8, 256], strides = [1, 1]} : vector<8x512xf32> to vector<8x256xf32>
    %5 = vector.extract_strided_slice %1 {offsets = [0, 256], sizes = [8, 256], strides = [1, 1]} : vector<8x512xf32> to vector<8x256xf32>
    %6 = math.log %2 : vector<8x256xf32>
    %7 = arith.mulf %4, %6 : vector<8x256xf32>
    %cst = arith.constant 1.000000e+01 : f32
    %8 = vector.broadcast %cst : f32 to vector<8x256xf32>
    %9 = arith.mulf %7, %8 : vector<8x256xf32>
    %cst_3 = arith.constant 1.000000e+00 : f32
    %10 = vector.broadcast %cst_3 : f32 to vector<8x256xf32>
    %11 = arith.subf %10, %4 : vector<8x256xf32>
    %cst_4 = arith.constant 1.000000e+00 : f32
    %12 = vector.broadcast %cst_4 : f32 to vector<8x256xf32>
    %13 = arith.subf %12, %2 : vector<8x256xf32>
    %14 = math.log %13 : vector<8x256xf32>
    %15 = arith.mulf %11, %14 : vector<8x256xf32>
    %16 = arith.addf %9, %15 : vector<8x256xf32>
    %cst_5 = arith.constant 0.000000e+00 : f32
    %17 = vector.broadcast %cst_5 : f32 to vector<8x256xf32>
    %18 = arith.subf %17, %16 : vector<8x256xf32>
    %cst_6 = arith.constant 1.000000e+00 : f32
    %19 = vector.broadcast %cst_6 : f32 to vector<8x256xf32>
    %20 = arith.cmpf oeq, %4, %19 : vector<8x256xf32>
    %21 = arith.subf %5, %3 : vector<8x256xf32>
    %22 = math.absf %21 : vector<8x256xf32>
    %cst_7 = arith.constant 0.055555556 : f32
    %23 = vector.broadcast %cst_7 : f32 to vector<8x256xf32>
    %24 = arith.mulf %22, %23 : vector<8x256xf32>
    %cst_8 = arith.constant 0.000000e+00 : f32
    %25 = vector.broadcast %cst_8 : f32 to vector<8x256xf32>
    %26 = arith.select %20, %24, %25 : vector<8x256xi1>, vector<8x256xf32>
    %27 = arith.addf %18, %26 : vector<8x256xf32>
    %28 = tpu.iota {dimensions = array<i32: 0>} : vector<8x1xi32>
    %c8_i32 = arith.constant 8 : i32
    %29 = arith.muli %arg0, %c8_i32 : i32
    %30 = vector.broadcast %29 : i32 to vector<8x1xi32>
    %31 = arith.addi %28, %30 : vector<8x1xi32>
    %c2_i32 = arith.constant 2 : i32
    %32 = vector.broadcast %c2_i32 : i32 to vector<8x1xi32>
    %33 = arith.cmpi slt, %31, %32 : vector<8x1xi32>
    %cst_9 = arith.constant 0.000000e+00 : f32
    %34 = vector.shape_cast %33 : vector<8x1xi1> to vector<8x1xi1>
    %35 = vector.broadcast %34 : vector<8x1xi1> to vector<8x256xi1>
    %36 = vector.broadcast %cst_9 : f32 to vector<8x256xf32>
    %37 = arith.select %35, %27, %36 : vector<8x256xi1>, vector<8x256xf32>
    %38 = vector.extract_strided_slice %37 {offsets = [0, 0], sizes = [8, 128], strides = [1, 1]} : vector<8x256xf32> to vector<8x128xf32>
    %39 = vector.extract_strided_slice %37 {offsets = [0, 128], sizes = [8, 128], strides = [1, 1]} : vector<8x256xf32> to vector<8x128xf32>
    %40 = arith.addf %38, %39 : vector<8x128xf32>
    %41 = vector.shape_cast %40 : vector<8x128xf32> to vector<1x8x128xf32>
    %cst_10 = arith.constant dense<0.000000e+00> : vector<8x128xf32>
    %42 = vector.multi_reduction <add>, %41, %cst_10 [0] : vector<1x8x128xf32> to vector<8x128xf32>
    %c0_11 = arith.constant 0 : index
    %c0_12 = arith.constant 0 : index
    %43 = vector.load %arg3[%c0_11, %c0_12] : memref<8x128xf32, #tpu.memory_space<vmem>>, vector<8x128xf32>
    tpu.vector_store %arg3[%c0_11, %c0_12], %42 {strides = array<i32>} : memref<8x128xf32, #tpu.memory_space<vmem>>, vector<8x128xf32>,
    return
  }
  func.func @transform_0(%arg0: i32) -> (i32, i32) {
    %c0_i32 = arith.constant 0 : i32
    %c0_i32_0 = arith.constant 0 : i32
    return %arg0, %c0_i32 : i32, i32
  }
  func.func @transform_1(%arg0: i32) -> (i32, i32) {
    %c0_i32 = arith.constant 0 : i32
    %c0_i32_0 = arith.constant 0 : i32
    return %arg0, %c0_i32 : i32, i32
  }
  func.func @transform_2(%arg0: i32) -> (i32, i32) {
    %c0_i32 = arith.constant 0 : i32
    %c0_i32_0 = arith.constant 0 : i32
    return %arg0, %c0_i32 : i32, i32
  }
}

</mosaic_0001>

<bundles_post_ra>
// kernel: tpu_custom_call.1
= control target key start
LH: loop header
LB: loop body
LE: loop exit
PB: predicated region body
PF: predicated region fallthrough
CT: control target
= control target key end

     0   :  { %7 = vsyncpa [#allocation3], 0  ;;  %s229_s0 = inlined_call_operand.hbm [shape: f32[8,512], index: 0, kind: input, shape index: {}]   ;;  %s230_s1 = inlined_call_operand.hbm [shape: f32[8,512], index: 1, kind: input, shape index: {}]   ;;  %s231_s2 = inlined_call_operand.hbm [shape: f32[8,128], index: 2, kind: output, shape index: {}]  }
   0x1   :  { %8 = vsyncpa [#allocation6], 0 }
   0x2   :  { %9 = vsyncpa [#allocation4], 0  ;;  %s15_s11 = sshll.u32 %s229_s0, 4  ;;  %s202_s12 = smov [#allocation2]   ;;  %s16_s11 = int_to_ptr.hbm [resolvable:$true] %s15_s11 }
   0x3   :  { %s17_s13 = sshll.u32 %s202_s12, 4  ;;  %s26_s16 = sshll.u32 %s230_s1, 4  ;;  %s18_s13 = int_to_ptr.vmem [resolvable:$true] %s17_s13  ;;  %s27_s16 = int_to_ptr.hbm [resolvable:$true] %s26_s16 }
   0x4   :  { %20 = dma.hbm_to_vmem [thread:$0]  %s16_s11, 512, %s18_s13, [#allocation3]  }
   0x5   :  { %s203_s17 = smov [#allocation5]  }
   0x6   :  { %s28_s18 = sshll.u32 %s203_s17, 4  ;;  %s29_s18 = int_to_ptr.vmem [resolvable:$true] %s28_s18 }
   0x7   :  { %31 = dma.hbm_to_vmem [thread:$0]  %s27_s16, 512, %s29_s18, [#allocation6]  }
   0x8   :  { %196 = dma.done.wait [#allocation3], 512  }
   0x9   :  { %197 = vsyncadd [#allocation3], 4294966784 }
   0xa   :  { %198 = dma.done.wait [#allocation6], 512  }
   0xb   :  { %199 = vsyncadd [#allocation6], 4294966784  ;;  %v40_v0 = vld [vmem:[#allocation2] sm:$0xff]  ;;  %v41_v1 = vld [vmem:[#allocation2 + $0x8] sm:$0xff]  ;;  %v82_v21 = vlaneseq  ;;  %s204_s0 = smov [#allocation7]   ;;  %s102_s21 = sshll.u32 %s231_s2, 4  ;;  %s103_s21 = int_to_ptr.hbm [resolvable:$true] %s102_s21 }
   0xc   :  { %v42_v2 = vld [vmem:[#allocation2 + $0x10] sm:$0xff]  ;;  %v43_v3 = vld [vmem:[#allocation2 + $0x18] sm:$0xff]  ;;  %116 = vlog2.f32 %v40_v0  ;;  %v58_v4 = vsub.f32 1.0, %v40_v0  ;;  %v59_v5 = vsub.f32 1.0, %v41_v1  ;;  %v44_v10 = vld [vmem:[#allocation5] sm:$0xff]  ;;  %s100_s1 = sshll.u32 %s204_s0, 4  ;;  %s101_s1 = int_to_ptr.vmem [resolvable:$true] %s100_s1 }
   0xd   :  { %v46_v6 = vld [vmem:[#allocation5 + $0x10] sm:$0xff]  ;;  %v47_v7 = vld [vmem:[#allocation5 + $0x18] sm:$0xff]  ;;  %118 = vlog2.f32 %v41_v1  ;;  %v45_v11 = vld [vmem:[#allocation5 + $0x8] sm:$0xff]  ;;  %v56_v16 = vsub.f32 1.0, %v44_v10  ;;  %vm70_vm0 = vcmp.eq.f32.partialorder %v44_v10, 1.0  ;;  %v83_v33 = vshrl.u32 %v82_v21, 7 }
   0xe   :  { %120 = vlog2.f32 %v58_v4  ;;  %v72_v8 = vsub.f32 %v46_v6, %v42_v2  ;;  %v73_v9 = vsub.f32 %v47_v7, %v43_v3  ;;  %v57_v20 = vsub.f32 1.0, %v45_v11 }
   0xf   :  { %122 = vlog2.f32 %v59_v5  ;;  %vm71_vm1 = vcmp.eq.f32.partialorder %v45_v11, 1.0  ;;  %vm87_vm2 = vcmp.lt.s32.totalorder %v83_v33, 2 }
  0x10   :  { %v74_v13 = vand.u32 2147483647, %v72_v8  ;;  %v75_v17 = vand.u32 2147483647, %v73_v9 }
  0x12   :  { %v117_v12 = vpop.eup %116  ;;  %v76_v27 = vmul.f32 0.055555556, %v74_v13  ;;  %v77_v30 = vmul.f32 0.055555556, %v75_v17 }
  0x13   :  { %v119_v14 = vpop.eup %118  ;;  %v49_v15 = vmul.f32 0.6931472, %v117_v12 }
  0x14   :  { %v121_v18 = vpop.eup %120  ;;  %v51_v19 = vmul.f32 0.6931472, %v119_v14  ;;  %v78_v36 = vsel %vm70_vm0, %v76_v27, 0.0  ;;  %v79_v38 = vsel %vm71_vm1, %v77_v30, 0.0 }
  0x15   :  { %v123_v22 = vpop.eup %122  ;;  %v52_v23 = vmul.f32 %v49_v15, %v44_v10  ;;  %v61_v24 = vmul.f32 0.6931472, %v121_v18 }
  0x16   :  { %v53_v25 = vmul.f32 %v51_v19, %v45_v11  ;;  %v63_v26 = vmul.f32 0.6931472, %v123_v22 }
  0x17   :  { %v54_v28 = vmul.f32 10.0, %v52_v23  ;;  %v64_v29 = vmul.f32 %v61_v24, %v56_v16 }
  0x18   :  { %v55_v31 = vmul.f32 10.0, %v53_v25  ;;  %v65_v32 = vmul.f32 %v63_v26, %v57_v20 }
  0x19   :  { %v66_v34 = vadd.f32 %v64_v29, %v54_v28 }
  0x1a   :  { %v67_v35 = vadd.f32 %v65_v32, %v55_v31 }
  0x1b   :  { %v68_v37 = vsub.f32 0.0, %v66_v34 }
  0x1c   :  { %v69_v39 = vsub.f32 0.0, %v67_v35 }
  0x1d   :  { %v80_v40 = vadd.f32 %v78_v36, %v68_v37 }
  0x1e   :  { %v81_v41 = vadd.f32 %v79_v38, %v69_v39 }
  0x1f   :  { %v90_v42 = vsel %vm87_vm2, %v80_v40, 0.0 }
  0x20   :  { %v91_v43 = vsel %vm87_vm2, %v81_v41, 0.0 }
  0x21   :  { %v92_v44 = vadd.f32 %v91_v43, %v90_v42 }
  0x23   :  { %94 = vst [vmem:[#allocation7] sm:$0xff] %v92_v44 }
  0x24   :  { %105 = dma.vmem_to_hbm [thread:$0]  %s101_s1, 128, %s103_s21, [#allocation4]  }
  0x25   :  { %200 = dma.done.wait [#allocation4], 128  }
  0x26   :  { %201 = vsyncadd [#allocation4], 4294967168 }
  0x27   :  { %110 = vsyncpa [#allocation3], 1 }
  0x28   :  { %111 = vsyncpa [#allocation6], 1 }
  0x29   :  { %112 = vsyncpa [#allocation4], 1 }

</bundles_post_ra>
